<compile_context>
chip_gen: v7x
topology: tpu7x:2x2x1
jax: 0.10.0
libtpu: 0.0.40
codegen_flags: <defaults>
</compile_context>

<pallas_src>
import functools
import math

import jax
import jax.numpy as jnp
from jax.experimental import pallas as pl
from jax.experimental.pallas import tpu as pltpu

LN_EPS = 1e-5       # nn.LayerNorm default
NEG_INF = -1e30     # additive mask for padded key tokens


def _round_up(x, m):
    return (x + m - 1) // m * m


def _nbytes(a):
    return math.prod(a.shape) * jnp.dtype(a.dtype).itemsize


def _layernorm(x, gamma, beta):
    mu = jnp.mean(x, axis=-1, keepdims=True)
    var = jnp.mean(jnp.square(x - mu), axis=-1, keepdims=True)
    return (x - mu) * jax.lax.rsqrt(var + LN_EPS) * gamma + beta


# ----------------------------- Pallas kernels ------------------------------ #

def _patch_embed_kernel(pv_ref, w_ref, posb_ref, cls_ref, o_ref, *, n_tokens):
    # pv_ref: (1, T, K) bf16   w_ref: (K, C) bf16
    # posb_ref: (T, C) f32 (= pos_embed + conv bias, folded in glue)
    # cls_ref: (1, C) f32
    # o_ref:  (1, S_pad, C) f32 -- row 0 = cls, rows 1..T = patches, rest = 0.
    x = pv_ref[0]
    y = jnp.dot(x, w_ref[...], preferred_element_type=jnp.float32) + posb_ref[...]
    s_pad, c = o_ref.shape[1], o_ref.shape[2]
    o_ref[0] = jnp.zeros((s_pad, c), jnp.float32)       # zero padding rows
    o_ref[0, 1:n_tokens + 1, :] = y                     # patch tokens
    o_ref[0, 0:1, :] = cls_ref[...]                     # cls token at row 0


def _vit_stack_kernel(x_ref, g1_ref, b1_ref, wq_ref, wk_ref, wv_ref,
                      bq_ref, bk_ref, bv_ref, wo_ref, bo_ref,
                      g2_ref, b2_ref, w1_ref, bb1_ref, w2_ref, bb2_ref,
                      lng_ref, lnb_ref, wh_ref, bh_ref,
                      o_ref, x_scr, *, num_heads, n_valid):
    layer = pl.program_id(1)
    n_layers = pl.num_programs(1)
    bf16 = jnp.bfloat16

    # Load embeddings into the VMEM-resident activation once per batch element.
    @pl.when(layer == 0)
    def _():
        x_scr[...] = x_ref[0]

    x = x_scr[...]                                      # (S, C) f32 residual
    S, C = x.shape
    nh = num_heads
    hd = C // nh
    scale = 1.0 / float(hd) ** 0.5

    # ---- multi-head self attention (batched over heads, no Python loop) ----
    h = _layernorm(x, g1_ref[0], b1_ref[0]).astype(bf16)        # (S, C)
    hb = jnp.broadcast_to(h[None], (nh, S, C))                  # (nh, S, C)
    q = jnp.einsum("hsc,hcd->hsd", hb, wq_ref[0],
                   preferred_element_type=jnp.float32) + bq_ref[0]   # (nh,S,hd)
    k = jnp.einsum("hsc,hcd->hsd", hb, wk_ref[0],
                   preferred_element_type=jnp.float32) + bk_ref[0]
    v = jnp.einsum("hsc,hcd->hsd", hb, wv_ref[0],
                   preferred_element_type=jnp.float32) + bv_ref[0]

    s = jnp.einsum("hqd,hkd->hqk", q.astype(bf16), k.astype(bf16),
                   preferred_element_type=jnp.float32) * scale       # (nh,S,S)
    # Mask padded key tokens (token axis is padded to a multiple of 8).
    kidx = jax.lax.broadcasted_iota(jnp.int32, (1, 1, S), 2)
    s = s + jnp.where(kidx < n_valid, 0.0, NEG_INF)
    s = s - jnp.max(s, axis=-1, keepdims=True)
    p = jnp.exp(s)
    p = p * pl.reciprocal(jnp.sum(p, axis=-1, keepdims=True), approx=True)

    o = jnp.einsum("hqk,hkd->hqd", p.astype(bf16), v.astype(bf16),
                   preferred_element_type=jnp.float32)               # (nh,S,hd)
    # Output projection folded per head: sum_h head_h @ Wproj[h] (no concat).
    proj = jnp.einsum("hsd,hdc->hsc", o.astype(bf16), wo_ref[0],
                      preferred_element_type=jnp.float32)            # (nh,S,C)
    x = x + jnp.sum(proj, axis=0) + bo_ref[0]

    # ---------------------------------- MLP ---------------------------------
    h2 = _layernorm(x, g2_ref[0], b2_ref[0]).astype(bf16)
    m = jnp.dot(h2, w1_ref[0], preferred_element_type=jnp.float32) + bb1_ref[0]
    # TODO(synk): nn.GELU default is exact erf; tanh-approx GELU is used in-kernel.
    m = jax.nn.gelu(m, approximate=True)
    m = jnp.dot(m.astype(bf16), w2_ref[0],
                preferred_element_type=jnp.float32) + bb2_ref[0]
    x = x + m
    x_scr[...] = x

    # ---- fused epilogue: final LayerNorm + classifier head on the cls row ----
    @pl.when(layer == n_layers - 1)
    def _():
        cls = x[0:1, :]                                              # (1, C)
        hc = _layernorm(cls, lng_ref[...], lnb_ref[...]).astype(bf16)
        o_ref[0] = (jnp.dot(hc, wh_ref[...], preferred_element_type=jnp.float32)
                    + bh_ref[...])


# ------------------------------ pallas_call wrappers ----------------------- #

def patch_embed(pvec, w_patch, posb, cls_tok, s_pad):
    B, T, K = pvec.shape
    C = w_patch.shape[1]
    kernel = functools.partial(_patch_embed_kernel, n_tokens=T)
    return pl.pallas_call(
        kernel,
        out_shape=jax.ShapeDtypeStruct((B, s_pad, C), jnp.float32),
        grid=(B,),
        in_specs=[
            pl.BlockSpec((1, T, K), lambda i: (i, 0, 0)),
            pl.BlockSpec((K, C), lambda i: (0, 0)),
            pl.BlockSpec((T, C), lambda i: (0, 0)),
            pl.BlockSpec((1, C), lambda i: (0, 0)),
        ],
        out_specs=pl.BlockSpec((1, s_pad, C), lambda i: (i, 0, 0)),
        compiler_params=pltpu.CompilerParams(dimension_semantics=("parallel",)),
    )(pvec, w_patch, posb, cls_tok)


def transformer_stack(x_emb, st, head, *, num_heads, n_valid):
    B, S, C = x_emb.shape
    L = st["g1"].shape[0]
    nh = num_heads
    hd = C // nh
    H = st["w1"].shape[-1]
    ncp = head["wh"].shape[-1]

    weight_keys = ["g1", "b1", "wq", "wk", "wv", "bq", "bk", "bv",
                   "wo", "bo", "g2", "b2", "w1", "bb1", "w2", "bb2"]
    head_keys = ["lng", "lnb", "wh", "bh"]

    def layer_spec(a):          # stacked per-layer weight: pick layer l
        shp = a.shape[1:]
        return pl.BlockSpec((1,) + shp, lambda b, l: (l,) + (0,) * len(shp))

    def const_spec(a):          # layer-independent (final LN + head) weights
        shp = a.shape
        return pl.BlockSpec(shp, lambda b, l: (0,) * len(shp))

    args = [x_emb] + [st[k] for k in weight_keys] + [head[k] for k in head_keys]
    in_specs = ([pl.BlockSpec((1, S, C), lambda b, l: (b, 0, 0))]
                + [layer_spec(st[k]) for k in weight_keys]
                + [const_spec(head[k]) for k in head_keys])

    # Advisory cost estimate so XLA schedules around the fused call sensibly.
    per_layer_flops = (2 * S * C * 3 * C        # qkv projections
                       + 4 * nh * S * S * hd    # q@k^T and p@v
                       + 2 * S * C * C          # output projection
                       + 4 * S * C * H)         # MLP
    flops = B * (L * per_layer_flops + 2 * C * ncp)
    transc = B * L * (nh * S * S + S * H)
    bytes_acc = _nbytes(x_emb) + B * sum(_nbytes(a) for a in args[1:]) + B * ncp * 4
    cost = pl.CostEstimate(flops=int(flops), transcendentals=int(transc),
                           bytes_accessed=int(bytes_acc))

    kernel = functools.partial(_vit_stack_kernel, num_heads=nh, n_valid=n_valid)
    return pl.pallas_call(
        kernel,
        out_shape=jax.ShapeDtypeStruct((B, 1, ncp), jnp.float32),
        grid=(B, L),                                  # layers innermost
        in_specs=in_specs,
        out_specs=pl.BlockSpec((1, 1, ncp), lambda b, l: (b, 0, 0)),
        scratch_shapes=[pltpu.VMEM((S, C), jnp.float32)],   # resident activation
        compiler_params=pltpu.CompilerParams(
            dimension_semantics=("parallel", "arbitrary"),
            vmem_limit_bytes=64 * 1024 * 1024),
        cost_estimate=cost,
    )(*args)


# ------------------------------- glue / model ------------------------------ #

def extract_patches(img, patch):
    """NCHW image -> (B, T, 3*p*p) patch vectors, t = h*Wp + w, flat = (cin, kh, kw)."""
    B, Cin, Hh, Ww = img.shape
    hp, wp = Hh // patch, Ww // patch
    x = img.reshape(B, Cin, hp, patch, wp, patch)
    x = x.transpose(0, 2, 4, 1, 3, 5)                 # (B, hp, wp, Cin, p, p)
    return x.reshape(B, hp * wp, Cin * patch * patch)


def prepare_params(params, *, num_heads):
    """Glue-time weight prep: bf16 casts, per-head stacking, bias/pos folding."""
    bf16 = jnp.bfloat16
    C = params["cls"].shape[-1]
    nh = num_heads
    hd = C // nh
    blocks = params["blocks"]

    def stack(fn, dtype=None):
        a = jnp.stack([fn(p) for p in blocks], axis=0)
        return a.astype(dtype) if dtype is not None else a

    stacked = {
        "g1": stack(lambda p: p["g1"]),
        "b1": stack(lambda p: p["b1"]),
        "wq": stack(lambda p: p["wqkv"][:, 0:C].reshape(C, nh, hd).transpose(1, 0, 2), bf16),
        "wk": stack(lambda p: p["wqkv"][:, C:2 * C].reshape(C, nh, hd).transpose(1, 0, 2), bf16),
        "wv": stack(lambda p: p["wqkv"][:, 2 * C:3 * C].reshape(C, nh, hd).transpose(1, 0, 2), bf16),
        "bq": stack(lambda p: p["bqkv"][0, 0:C].reshape(nh, 1, hd)),
        "bk": stack(lambda p: p["bqkv"][0, C:2 * C].reshape(nh, 1, hd)),
        "bv": stack(lambda p: p["bqkv"][0, 2 * C:3 * C].reshape(nh, 1, hd)),
        "wo": stack(lambda p: p["wproj"].reshape(nh, hd, C), bf16),
        "bo": stack(lambda p: p["bproj"]),
        "g2": stack(lambda p: p["g2"]),
        "b2": stack(lambda p: p["b2"]),
        "w1": stack(lambda p: p["w1"], bf16),
        "bb1": stack(lambda p: p["bb1"]),
        "w2": stack(lambda p: p["w2"], bf16),
        "bb2": stack(lambda p: p["bb2"]),
    }

    classes = params["head_b"].shape[0]
    nc_pad = _round_up(classes, 128)                   # lane-dense head output
    wh = jnp.zeros((C, nc_pad), jnp.float32).at[:, :classes].set(params["head_w"].T)
    bh = jnp.zeros((1, nc_pad), jnp.float32).at[:, :classes].set(params["head_b"][None, :])
    head = {
        "lng": params["ln_g"].reshape(1, C),
        "lnb": params["ln_b"].reshape(1, C),
        "wh": wh.astype(bf16),
        "bh": bh,
    }

    w_patch = params["conv_w"].reshape(C, -1).T.astype(bf16)          # (K, C)
    posb = params["pos"][:, 0, :] + params["conv_b"][None, :]         # pos + conv bias
    cls_tok = params["cls"].reshape(1, C)
    return {"stacked": stacked, "head": head, "w_patch": w_patch,
            "posb": posb, "cls": cls_tok, "classes": classes}


def vit_cls_forward(params, img, *, patch, num_heads):
    prep = prepare_params(params, num_heads=num_heads)
    pvec = extract_patches(img, patch).astype(jnp.bfloat16)           # (B, T, K)
    B, T, _ = pvec.shape
    n_valid = T + 1                                                   # + cls token
    s_pad = _round_up(n_valid, 8)
    x = patch_embed(pvec, prep["w_patch"], prep["posb"], prep["cls"], s_pad)
    logits = transformer_stack(x, prep["stacked"], prep["head"],
                               num_heads=num_heads, n_valid=n_valid)  # (B,1,NCp)
    return logits[:, 0, :prep["classes"]]


def init_params(key, *, patch, img, C, layers, heads, classes):
    T = (img // patch) ** 2
    H = 4 * C
    keys = jax.random.split(key, 8 + layers)

    def nrm(k, shape, std=0.02):
        return (std * jax.random.normal(k, shape)).astype(jnp.float32)

    params = {
        "cls": nrm(keys[0], (1, 1, C)),
        "pos": nrm(keys[1], (T, 1, C)),
        "conv_w": nrm(keys[2], (C, 3, patch, patch)),     # PyTorch Conv2d layout
        "conv_b": nrm(keys[3], (C,)),
        "ln_g": jnp.ones((C,), jnp.float32),
        "ln_b": jnp.zeros((C,), jnp.float32),
        "head_w": nrm(keys[4], (classes, C)),             # PyTorch Linear layout
        "head_b": nrm(keys[5], (classes,)),
        "blocks": [],
    }
    for l in range(layers):
        ks = jax.random.split(keys[8 + l], 8)
        params["blocks"].append({
            "g1": jnp.ones((1, C), jnp.float32), "b1": jnp.zeros((1, C), jnp.float32),
            "wqkv": nrm(ks[0], (C, 3 * C)),               # stored transposed (x @ W)
            "bqkv": nrm(ks[1], (1, 3 * C)),
            "wproj": nrm(ks[2], (C, C)),
            "bproj": nrm(ks[3], (1, C)),
            "g2": jnp.ones((1, C), jnp.float32), "b2": jnp.zeros((1, C), jnp.float32),
            "w1": nrm(ks[4], (C, H)), "bb1": nrm(ks[5], (1, H)),
            "w2": nrm(ks[6], (H, C)), "bb2": nrm(ks[7], (1, C)),
        })
    return params


def reference_forward(params, img, *, patch, num_heads):
    """Pure-JAX f32 reference with identical math (for validation)."""
    B = img.shape[0]
    C = params["cls"].shape[-1]
    pvec = extract_patches(img, patch)
    w_mat = params["conv_w"].reshape(C, -1).T
    x = pvec @ w_mat + params["conv_b"][None, None, :] + params["pos"][:, 0, :][None]
    cls = jnp.broadcast_to(params["cls"].reshape(1, 1, C), (B, 1, C))
    x = jnp.concatenate([cls, x], axis=1)

    def ln(t, g, b):
        mu = t.mean(-1, keepdims=True)
        var = ((t - mu) ** 2).mean(-1, keepdims=True)
        return (t - mu) / jnp.sqrt(var + LN_EPS) * g + b

    hd = C // num_heads
    for p in params["blocks"]:
        h = ln(x, p["g1"], p["b1"])
        qkv = h @ p["wqkv"] + p["bqkv"]
        q, k, v = jnp.split(qkv, 3, axis=-1)
        sh = lambda t: t.reshape(B, -1, num_heads, hd).transpose(0, 2, 1, 3)
        qh, kh, vh = sh(q), sh(k), sh(v)
        s = jnp.einsum("bhqd,bhkd->bhqk", qh, kh) / (hd ** 0.5)
        a = jax.nn.softmax(s, axis=-1)
        o = jnp.einsum("bhqk,bhkd->bhqd", a, vh).transpose(0, 2, 1, 3).reshape(B, -1, C)
        x = x + (o @ p["wproj"] + p["bproj"])
        h2 = ln(x, p["g2"], p["b2"])
        m = jax.nn.gelu(h2 @ p["w1"] + p["bb1"], approximate=True)
        x = x + (m @ p["w2"] + p["bb2"])
    x = ln(x, params["ln_g"], params["ln_b"])
    return x[:, 0, :] @ params["head_w"].T + params["head_b"]


if __name__ == "__main__":
    # Small, module-consistent shapes: image 16x16, patch 4 -> 16 tokens (+cls,
    # padded to 24), embedding 64, 2 layers, 2 heads (head dim 32), 10 classes
    # (padded to 128 for the kernel output), batch 2.
    patch, img_size, C, layers, heads, classes, B = 4, 16, 64, 2, 2, 10, 2

    key = jax.random.PRNGKey(0)
    pkey, xkey = jax.random.split(key)
    params = init_params(pkey, patch=patch, img=img_size, C=C, layers=layers,
                         heads=heads, classes=classes)
    img = jax.random.normal(xkey, (B, 3, img_size, img_size), jnp.float32)

    out = jax.block_until_ready(
        vit_cls_forward(params, img, patch=patch, num_heads=heads))
    assert out.shape == (B, classes), out.shape

    ref = reference_forward(params, img, patch=patch, num_heads=heads)
    max_err = float(jnp.max(jnp.abs(out - ref)))
    assert jnp.allclose(out, ref, atol=2e-2, rtol=2e-2), f"max |err| = {max_err}"

    print("KERNEL_OK")
</pallas_src>

<mosaic_0001>
module attributes {stable_mosaic.version = 11 : i64} {
  func.func @_patch_embed_kernel(%arg0: i32, %arg1: memref<1x16x48xbf16, #tpu.memory_space<vmem>>, %arg2: memref<48x64xbf16, #tpu.memory_space<vmem>>, %arg3: memref<16x64xf32, #tpu.memory_space<vmem>>, %arg4: memref<1x64xf32, #tpu.memory_space<vmem>>, %arg5: memref<1x24x64xf32, #tpu.memory_space<vmem>>) attributes {dimension_semantics = [#tpu.dimension_semantics<parallel>], iteration_bounds = array<i64: 2>, scalar_prefetch = 0 : i64, scratch_operands = 0 : i64, tpu.core_type = #tpu.core_type<tc>, window_params = [{transform_indices = @transform_0, window_bounds = array<i64: 1, 16, 48>}, {pipeline_mode = #tpu.pipeline_mode<synchronous>, transform_indices = @transform_1, window_bounds = array<i64: 48, 64>}, {pipeline_mode = #tpu.pipeline_mode<synchronous>, transform_indices = @transform_2, window_bounds = array<i64: 16, 64>}, {pipeline_mode = #tpu.pipeline_mode<synchronous>, transform_indices = @transform_3, window_bounds = array<i64: 1, 64>}, {transform_indices = @transform_4, window_bounds = array<i64: 1, 24, 64>}]} {
    %c0 = arith.constant 0 : index
    %c0_0 = arith.constant 0 : index
    %c0_1 = arith.constant 0 : index
    %0 = vector.load %arg1[%c0, %c0_0, %c0_1] : memref<1x16x48xbf16, #tpu.memory_space<vmem>>, vector<1x16x48xbf16>
    %1 = vector.shape_cast %0 : vector<1x16x48xbf16> to vector<16x48xbf16>
    %c0_2 = arith.constant 0 : index
    %c0_3 = arith.constant 0 : index
    %2 = vector.load %arg2[%c0_2, %c0_3] : memref<48x64xbf16, #tpu.memory_space<vmem>>, vector<48x64xbf16>
    %cst = arith.constant dense<0.000000e+00> : vector<16x64xf32>
    %3 = tpu.matmul %1, %2, %cst {dimension_numbers = #tpu.dot_dimension_numbers<[1], [0], [0], [1], [0, 0, 1, 1], [], []>} : vector<16x48xbf16>, vector<48x64xbf16>, vector<16x64xf32> -> vector<16x64xf32>
    %c0_4 = arith.constant 0 : index
    %c0_5 = arith.constant 0 : index
    %4 = vector.load %arg3[%c0_4, %c0_5] : memref<16x64xf32, #tpu.memory_space<vmem>>, vector<16x64xf32>
    %5 = arith.addf %3, %4 : vector<16x64xf32>
    %cst_6 = arith.constant 0.000000e+00 : f32
    %6 = vector.broadcast %cst_6 : f32 to vector<24x64xf32>
    %c0_7 = arith.constant 0 : index
    %c0_8 = arith.constant 0 : index
    %c0_9 = arith.constant 0 : index
    %7 = vector.load %arg5[%c0_7, %c0_8, %c0_9] : memref<1x24x64xf32, #tpu.memory_space<vmem>>, vector<1x24x64xf32>
    %8 = vector.shape_cast %7 : vector<1x24x64xf32> to vector<24x64xf32>
    %9 = vector.shape_cast %6 : vector<24x64xf32> to vector<1x24x64xf32>
    tpu.vector_store %arg5[%c0_7, %c0_8, %c0_9], %9 {strides = array<i32>} : memref<1x24x64xf32, #tpu.memory_space<vmem>>, vector<1x24x64xf32>,
    %c0_10 = arith.constant 0 : index
    %c1 = arith.constant 1 : index
    %c0_11 = arith.constant 0 : index
    %10 = vector.load %arg5[%c0_10, %c1, %c0_11] : memref<1x24x64xf32, #tpu.memory_space<vmem>>, vector<1x16x64xf32>
    %11 = vector.shape_cast %10 : vector<1x16x64xf32> to vector<16x64xf32>
    %12 = vector.shape_cast %5 : vector<16x64xf32> to vector<1x16x64xf32>
    tpu.vector_store %arg5[%c0_10, %c1, %c0_11], %12 {strides = array<i32>} : memref<1x24x64xf32, #tpu.memory_space<vmem>>, vector<1x16x64xf32>,
    %c0_12 = arith.constant 0 : index
    %c0_13 = arith.constant 0 : index
    %13 = vector.load %arg4[%c0_12, %c0_13] : memref<1x64xf32, #tpu.memory_space<vmem>>, vector<1x64xf32>
    %c0_14 = arith.constant 0 : index
    %c0_15 = arith.constant 0 : index
    %c0_16 = arith.constant 0 : index
    %14 = vector.load %arg5[%c0_14, %c0_15, %c0_16] : memref<1x24x64xf32, #tpu.memory_space<vmem>>, vector<1x1x64xf32>
    %15 = vector.shape_cast %14 : vector<1x1x64xf32> to vector<1x64xf32>
    %16 = vector.shape_cast %13 : vector<1x64xf32> to vector<1x1x64xf32>
    tpu.vector_store %arg5[%c0_14, %c0_15, %c0_16], %16 {strides = array<i32>} : memref<1x24x64xf32, #tpu.memory_space<vmem>>, vector<1x1x64xf32>,
    return
  }
  func.func @transform_0(%arg0: i32) -> (i32, i32, i32) {
    %c0_i32 = arith.constant 0 : i32
    %c0_i32_0 = arith.constant 0 : i32
    %c0_i32_1 = arith.constant 0 : i32
    return %arg0, %c0_i32, %c0_i32_0 : i32, i32, i32
  }
  func.func @transform_1(%arg0: i32) -> (i32, i32) {
    %c0_i32 = arith.constant 0 : i32
    %c0_i32_0 = arith.constant 0 : i32
    %c0_i32_1 = arith.constant 0 : i32
    return %c0_i32, %c0_i32_0 : i32, i32
  }
  func.func @transform_2(%arg0: i32) -> (i32, i32) {
    %c0_i32 = arith.constant 0 : i32
    %c0_i32_0 = arith.constant 0 : i32
    %c0_i32_1 = arith.constant 0 : i32
    return %c0_i32, %c0_i32_0 : i32, i32
  }
  func.func @transform_3(%arg0: i32) -> (i32, i32) {
    %c0_i32 = arith.constant 0 : i32
    %c0_i32_0 = arith.constant 0 : i32
    %c0_i32_1 = arith.constant 0 : i32
    return %c0_i32, %c0_i32_0 : i32, i32
  }
  func.func @transform_4(%arg0: i32) -> (i32, i32, i32) {
    %c0_i32 = arith.constant 0 : i32
    %c0_i32_0 = arith.constant 0 : i32
    %c0_i32_1 = arith.constant 0 : i32
    return %arg0, %c0_i32, %c0_i32_0 : i32, i32, i32
  }
}

</mosaic_0001>

<bundles_post_ra>
// kernel: tpu_custom_call.1
= control target key start
LH: loop header
LB: loop body
LE: loop exit
PB: predicated region body
PF: predicated region fallthrough
CT: control target
= control target key end

     0   :  { %9 = vsyncpa [#allocation3], 0  ;;  %s1008_s0 = inlined_call_operand.hbm [shape: bf16[2,16,48], index: 0, kind: input, shape index: {}]   ;;  %s1009_s1 = inlined_call_operand.hbm [shape: bf16[48,64], index: 1, kind: input, shape index: {}]   ;;  %s1010_s2 = inlined_call_operand.hbm [shape: f32[16,64], index: 2, kind: input, shape index: {}]   ;;  %s1011_s3 = inlined_call_operand.vmem [shape: f32[1,64], index: 3, kind: input, shape index: {}]   ;;  %s1012_s4 = inlined_call_operand.hbm [shape: f32[2,24,64], index: 4, kind: output, shape index: {}]  }
   0x1   :  { %11 = vsyncpa [#allocation3 + $0x1], 0 }
   0x2   :  { %12 = vsyncpa [#allocation6], 0 }
   0x3   :  { %13 = vsyncpa [#allocation4], 0 }
   0x4   :  { %15 = vsyncpa [#allocation4 + $0x1], 0  ;;  %s750_s15 = smov 0   ;;  %s752_s16 = smov 0  }
   0x5   :  { %s754_s17 = smov 0   ;;  %s756_s18 = smov 0  }
   0x6 LB: > { %s771_s19 = sadd.s32 4294967295, %s711_s18   ;;  %s439_s20 = sadd.s32 4294967294, %s711_s18   ;;  %s711_s18 = sphi %s756_s18, %s1032_s18   ;;  %s707_s17 = sphi %s754_s17, %s1031_s17   ;;  %s703_s16 = sphi %s752_s16, %s1030_s16   ;;  %s699_s15 = sphi %s750_s15, %s1029_s15  }
   0x7   : > { %p41_p0 = scmp.ne.s32.totalorder %s703_s16, %s699_s15  ;;  %p1013_p1 = scmp.eq.s32.totalorder %s771_s19, 0 }
   0x8   : > { %p134_p3 = scmp.eq.s32.totalorder %s439_s20, 1  ;;  %p440_p5 = scmp.ge.s32.totalorder %s711_s18, 1 }
   0x9   : > { %p780_p4 = por %p1013_p1, %p41_p0  ;;  %p141_p7 = scmp.lt.s32.totalorder %s711_s18, 3 }
   0xa   : > { %p785_p6 = por %p134_p3, %p41_p0  ;;  %s713_s24 = smov [#allocation5]  }
   0xb   : > { %s1016_s21 = scalar_select %p780_p4, 1, 0 }
   0xc   : > { %s1017_s22 = scalar_select %p785_p6, 1, 0 }
   0xd   : > { %p790_p8 = pnand %p440_p5, %p141_p7  ;;  %s153_s25 = sshll.u32 %s713_s24, 4  ;;  %s794_s25 = int_to_ptr.vmem [resolvable:$true] %s153_s25 }
   0xe   : > { %s714_s27 = smov [#allocation7]   ;;  %s555_s5 = scalar_lea.hbm %s1009_s1, 384 }
   0xf   : > { %p488_p9 = pneg %p790_p8  ;;  %s166_s28 = sshll.u32 %s714_s27, 4  ;;  %s805_s28 = int_to_ptr.vmem [resolvable:$true] %s166_s28 }
  0x10   : > { %p556_p12 = scmp.ne.s32.totalorder %s1009_s1, %s555_s5  ;;  %p562_p5 = scmp.lt.u32.totalorder %s555_s5, %s1009_s1 }
  0x11   : > { %p801_p11 = pnand %p488_p9, %p1013_p1 }
  0x13   : > { %p557_p13 = pneg %p801_p11 }
  0x15   : > { %p558_p0 = pnand %p557_p13, %p556_p12 }
  0x17   : > { %p559_p3 = pneg %p558_p0 }
  0x19   : > { %p564_p7 = pnand %p562_p5, %p559_p3 }
  0x1b   : > { %567 = shalt.err (!%p564_p7)
}
  0x1c   : > { %s568_s10 = scalar_lea.vmem %s794_s25, 384  ;;  %p576_p2 = scmp.lt.s32.totalorder %s794_s25, %s794_s25 }
  0x1d   : > { %p569_p9 = scmp.ne.s32.totalorder %s794_s25, %s568_s10  ;;  %p577_p12 = scmp.lt.s32.totalorder %s568_s10, %s568_s10 }
  0x1f   : > { %p571_p10 = pnand %p569_p9, %p557_p13  ;;  %p578_p0 = por %p577_p12, %p576_p2 }
  0x21   : > { %p572_p1 = pneg %p571_p10 }
  0x23   : > { %p579_p6 = pnand %p578_p0, %p572_p1 }
  0x25   : > { %582 = shalt.err (!%p579_p6)
}
  0x26   : > { %s715_s11 = smov 64   ;;  %s716_s12 = smov 4  }
  0x27   : > { %491 = dma.hbm_to_vmem [thread:$0]  (!%p801_p11), %s1009_s1, 384, %s794_s25, [#allocation6], %s715_s11, %s715_s11, %s716_s12  }
  0x28   : > { %s583_s27 = scalar_lea.hbm %s1010_s2, 256 }
  0x29   : > { %p584_p1 = scmp.ne.s32.totalorder %s1010_s2, %s583_s27  ;;  %p590_p10 = scmp.lt.u32.totalorder %s583_s27, %s1010_s2 }
  0x2b   : > { %p586_p2 = pnand %p584_p1, %p557_p13 }
  0x2d   : > { %p587_p6 = pneg %p586_p2 }
  0x2f   : > { %p592_p3 = pnand %p590_p10, %p587_p6 }
  0x31   : > { %595 = shalt.err (!%p592_p3)
}
  0x32   : > { %s596_s25 = scalar_lea.vmem %s805_s28, 256  ;;  %p604_p12 = scmp.lt.s32.totalorder %s805_s28, %s805_s28 }
  0x33   : > { %p597_p5 = scmp.ne.s32.totalorder %s805_s28, %s596_s25  ;;  %p605_p0 = scmp.lt.s32.totalorder %s596_s25, %s596_s25 }
  0x35   : > { %p599_p7 = pnand %p597_p5, %p557_p13  ;;  %p606_p1 = por %p605_p0, %p604_p12 }
  0x37   : > { %p600_p9 = pneg %p599_p7 }
  0x39   : > { %p607_p2 = pnand %p606_p1, %p600_p9 }
  0x3b   : > { %610 = shalt.err (!%p607_p2)
}
  0x3c   : > { %s717_s7 = smov 128   ;;  %s718_s8 = smov 8  }
  0x3d   : > { %494 = dma.hbm_to_vmem [thread:$0]  (!%p801_p11), %s1010_s2, 256, %s805_s28, [#allocation6], %s717_s7, %s717_s7, %s718_s8  }
  0x3e   : > { %s863_s13 = sadd.s32 1, %s711_s18   ;;  %s28_s20 = sadd.s32 1, %s707_s17 }
  0x3f   : > { %s25_s14 = ssub.s32 %s711_s18, %s863_s13  ;;  %p35_p6 = scmp.ne.s32.totalorder %s707_s17, %s703_s16 }
  0x40   : > { %p26_p13 = scmp.eq.s32.totalorder %s25_s14, 0  ;;  %p36_p10 = scmp.eq.s32.totalorder %s711_s18, 0 }
  0x41   : > { %p1020_p5 = scmp.eq.s32.totalorder %s771_s19, 1  ;;  %p505_p9 = scmp.lt.s32.totalorder %s711_s18, 2 }
  0x42   : > { %s872_s24 = scalar_select %p26_p13, %s707_s17, %s28_s20  }
  0x43   : > { %p37_p3 = por %p36_p10, %p35_p6  ;;  %p876_p7 = por %p1020_p5, %p35_p6 }
  0x44   : > { %s183_s26 = sand.u32 1, %s707_s17   ;;  %s459_s28 = sshll.u32 %s711_s18, 7 }
  0x45   : > { %s1021_s27 = scalar_select %p876_p7, 1, 0 }
  0x46   : > { %s444_s29 = sshll.u32 %s183_s26, 3  ;;  %s886_s6 = scalar_lea.hbm %s1008_s0, %s459_s28 }
  0x47   : > { %s187_s25 = scalar_lea.vmem [#allocation2], %s444_s29  ;;  %p890_p11 = pnand %p505_p9, %p37_p3 }
  0x48   : > { %s194_s7 = sshll.u32 %s187_s25, 4  ;;  %s894_s9 = scalar_lea.sflag [#allocation3], %s183_s26  ;;  %s888_s7 = int_to_ptr.vmem [resolvable:$true] %s194_s7 }
  0x49   : > { %s611_s10 = scalar_lea.hbm %s886_s6, 128  ;;  %p613_p0 = pneg %p890_p11 }
  0x4a   : > { %p612_p12 = scmp.ne.s32.totalorder %s886_s6, %s611_s10  ;;  %s616_s29 = scalar_lea.hbm %s1008_s0, 256 }
  0x4b   : > { %p617_p13 = scmp.lt.u32.totalorder %s886_s6, %s1008_s0  ;;  %p618_p6 = scmp.lt.u32.totalorder %s616_s29, %s611_s10 }
  0x4c   : > { %p614_p1 = pnand %p613_p0, %p612_p12  ;;  %p620_p3 = scmp.lt.u32.totalorder %s611_s10, %s886_s6 }
  0x4d   : > { %p619_p10 = por %p618_p6, %p617_p13 }
  0x4e   : > { %p615_p2 = pneg %p614_p1 }
  0x4f   : > { %p621_p5 = por %p620_p3, %p619_p10 }
  0x51   : > { %p622_p9 = pnand %p621_p5, %p615_p2 }
  0x53   : > { %625 = shalt.err (!%p622_p9)
}
  0x54   : > { %s626_s26 = scalar_lea.vmem %s888_s7, 128  ;;  %s719_s5 = smov [#allocation2]  }
  0x55   : > { %p627_p12 = scmp.ne.s32.totalorder %s888_s7, %s626_s26  ;;  %s631_s25 = sshll.u32 %s719_s5, 4  ;;  %s632_s25 = int_to_ptr.vmem [resolvable:$false] %s631_s25 }
  0x56   : > { %s633_s14 = scalar_lea.vmem %s632_s25, 256  ;;  %p634_p4 = scmp.lt.s32.totalorder %s888_s7, %s632_s25 }
  0x57   : > { %p629_p1 = pnand %p627_p12, %p613_p0  ;;  %p635_p13 = scmp.lt.s32.totalorder %s633_s14, %s626_s26 }
  0x59   : > { %p630_p7 = pneg %p629_p1  ;;  %p636_p6 = por %p635_p13, %p634_p4 }
  0x5b   : > { %p637_p10 = pnand %p636_p6, %p630_p7 }
  0x5d   : > { %640 = shalt.err (!%p637_p10)
}
  0x5e   : > { %498 = dma.hbm_to_vmem [thread:$0]  (!%p890_p11), %s886_s6, 128, %s888_s7, %s894_s9, %s715_s11, %s715_s11, %s716_s12  }
  0x5f   : > { %206 = sbr.rel (%p790_p8) target bundleno = 350 (0x15e), region = 36  ;;  %s928_s10 = sand.u32 (!%p790_p8), 1, %s703_s16  }
  0x60   : > { %s448_s20 = sshll.u32 (!%p790_p8), %s928_s10, 3  ;;  %s209_s29 = scalar_lea.sflag (!%p790_p8), [#allocation3], %s928_s10 }
  0x61   : > { %s212_s28 = scalar_lea.vmem (!%p790_p8), [#allocation2], %s448_s20  ;;  %p1023_p4 = scmp.ne.s32.totalorder (!%p790_p8), %s1016_s21, 0 }
  0x66   : > { %686 = dma.done.wait (%p1023_p4), %s209_s29, 128  }
  0x67   : > { %688 = vsyncadd (%p1023_p4), %s209_s29, 4294967168  ;;  %p1024_p7 = scmp.eq.s32.totalorder %s771_s19, 0 }
  0x69   : > { %690 = dma.done.wait (%p1024_p7), [#allocation6], 640   ;;  %p1025_p11 = pmov %p1024_p7 }
  0x6a   : > { %s474_s23 = smul.u32 24, %s928_s10  ;;  %vm324_vm0 = vcmask 523264   ;;  %v720_v0 = vmov 0.0   ;;  %vm721_vm1 = vmmov 0   ;;  %v551_v1 = vld [vmem:[#allocation5] sm:$0xff]   ;;  %v552_v2 = vld [vmem:[#allocation5 + $0x8] sm:$0xff]  }
  0x6b   : > { %692 = vsyncadd (%p1025_p11), [#allocation6], 4294966656  ;;  %464 = vmatprep.subr.bf16.mxu0 %v720_v0  ;;  %470 = vmatprep.mubr.msk.bf16.mxu0 %vm721_vm1, %v720_v0  ;;  %v553_v3 = vld [vmem:[#allocation5 + $0x10] sm:$0xff]   ;;  %vm279_vm2 = vcmask 392192   ;;  %vm331_vm3 = vcmask 516096   ;;  %v254_v6 = vld [vmem:[#allocation7] sm:$0xff] }
  0x6c   : > { %s941_s11 = scalar_lea.vmem [#allocation8], %s474_s23  ;;  %465 = vmatpush3.bf16.msra.mxu0 %v551_v1  ;;  %v554_v4 = vld [vmem:[%s212_s28] sm:$0xff]   ;;  %s475_s6 = smul.u32 384, %s771_s19  ;;  %v255_v8 = vld [vmem:[#allocation7 + $0x8] sm:$0xff] }
  0x6d   : > { %325 = vst.msk [vmem:[%s941_s11] sm:$0xff] %vm324_vm0, %v720_v0  ;;  %326 = vst.msk [vmem:[%s941_s11 + $0x8] sm:$0xff] %vm324_vm0, %v720_v0  ;;  %466 = vmatprep.subr.bf16.mxu0 %v720_v0  ;;  %v330_v5 = vld [vmem:[%s1011_s3] sm:$0x1]  ;;  %s347_s7 = sshll.u32 %s941_s11, 4  ;;  %s334_s19 = scalar_lea.sflag [#allocation4], %s928_s10  ;;  %s960_s7 = int_to_ptr.vmem [resolvable:$true] %s347_s7 }
  0x6e   : > { %327 = vst.msk [vmem:[%s941_s11 + $0x10] sm:$0xff] %vm324_vm0, %v720_v0  ;;  %s958_s30 = scalar_lea.hbm %s1012_s4, %s475_s6  ;;  %s641_s26 = scalar_lea.vmem %s960_s7, 384 }
  0x6f   : > { %332 = vst.msk [vmem:[%s941_s11] sm:$0x1] %vm331_vm3, %v330_v5  ;;  %p642_p8 = scmp.ne.s32.totalorder %s960_s7, %s641_s26  ;;  %p1026_p0 = scmp.ne.s32.totalorder %s1021_s27, 0 }
  0x70   : > { %467 = vmatpush3.bf16.msra.mxu0 %v552_v2  ;;  %s722_s5 = smov [#allocation8]  }
  0x71   : > { %468 = vmatprep.subr.bf16.mxu0 %v720_v0  ;;  %p643_p2 = pnand %p642_p8, %p1026_p0  ;;  %s645_s25 = sshll.u32 %s722_s5, 4  ;;  %s646_s25 = int_to_ptr.vmem [resolvable:$false] %s645_s25 }
  0x72   : > { %s647_s14 = scalar_lea.vmem %s646_s25, 768  ;;  %p648_p5 = scmp.lt.s32.totalorder %s960_s7, %s646_s25 }
  0x73   : > { %p644_p3 = pneg %p643_p2  ;;  %p649_p9 = scmp.lt.s32.totalorder %s647_s14, %s641_s26 }
  0x74   : > { %469 = vmatpush3.bf16.msra.mxu0 %v553_v3 }
  0x75   : > { %p650_p12 = por %p649_p9, %p648_p5 }
  0x77   : > { %471 = vmatmul.mubr.msk.bf16.vlgmr.msra.gmra.mrb[0].mxu0 %vm279_vm2, %v554_v4  ;;  %p651_p1 = pnand %p650_p12, %p644_p3 }
 0x14a   : > { %v317_v7 = vpop.f32.mrb[0].mxu0 }
 0x14b   : > { %v318_v9 = vadd.f32 %v317_v7, %v254_v6  ;;  %v472_v10 = vpop.f32.mrb[1].mxu0 }
 0x14c   : > { %v320_v11 = vpop.f32.mrb[2].mxu0 }
 0x14d   : > { %328 = vst.msk [vmem:[%s941_s11 + $0x1] sm:$0xff] %vm324_vm0, %v318_v9  ;;  %v321_v12 = vadd.f32 %v320_v11, %v255_v8  ;;  %v473_v13 = vpop.f32.mrb[3].mxu0 }
 0x14f   : > { %329 = vst.msk [vmem:[%s941_s11 + $0x9] sm:$0xff] %vm324_vm0, %v321_v12 }
 0x150   : > { %654 = shalt.err (!%p651_p1)
}
 0x151   : > { %s655_s20 = scalar_lea.hbm %s958_s30, 384  ;;  %s659_s23 = scalar_lea.hbm %s1012_s4, 768 }
 0x152   : > { %p656_p13 = scmp.ne.s32.totalorder %s958_s30, %s655_s20  ;;  %p660_p4 = scmp.lt.u32.totalorder %s958_s30, %s1012_s4 }
 0x153   : > { %p661_p7 = scmp.lt.u32.totalorder %s659_s23, %s655_s20  ;;  %p663_p8 = scmp.lt.u32.totalorder %s655_s20, %s958_s30 }
 0x154   : > { %p657_p6 = pnand %p656_p13, %p1026_p0 }
 0x155   : > { %p662_p11 = por %p661_p7, %p660_p4 }
 0x156   : > { %p658_p10 = pneg %p657_p6 }
 0x157   : > { %p664_p2 = por %p663_p8, %p662_p11 }
 0x159   : > { %p665_p3 = pnand %p664_p2, %p658_p10 }
 0x15b   : > { %668 = shalt.err (!%p665_p3)
}
 0x15c   : > { %s723_s12 = smov 128   ;;  %s724_s6 = smov 8  }
 0x15d   : > { %486 = dma.vmem_to_hbm [thread:$0]  (%p1026_p0), %s960_s7, 384, %s958_s30, %s334_s19, %s723_s12, %s723_s12, %s724_s6  }
 0x15e PF: > { %s362_s8 = sand.u32 1, %s699_s15   ;;  %p1027_p5 = scmp.ne.s32.totalorder %s1017_s22, 0 }
 0x15f   : > { %p1028_p9 = scmp.ge.s32.totalorder %s711_s18, 2  ;;  %s363_s9 = scalar_lea.sflag [#allocation4], %s362_s8 }
 0x161   : > { %p500_p12 = pnand %p1028_p9, %p1027_p5 }
 0x163   : > { %694 = dma.done.wait (!%p500_p12), %s363_s9, 384  }
 0x164   : > { %696 = vsyncadd (!%p500_p12), %s363_s9, 4294966912  ;;  %p18_p1 = scmp.ge.s32.totalorder %s863_s13, 4   ;;  %s1029_s15 = smov %s703_s16 }
 0x165   : > { %s1030_s16 = smov %s707_s17  ;;  %s1031_s17 = smov %s872_s24 }
 0x166   : > { %s1032_s18 = smov %s863_s13  ;;  %20 = sbr.rel (!%p18_p1) target bundleno = 6 (0x6), region = 89 }
 0x16d   :  { %368 = vsyncpa [#allocation3], 1 }
 0x16e   :  { %370 = vsyncpa [#allocation3 + $0x1], 1 }
 0x16f   :  { %371 = vsyncpa [#allocation6], 1 }
 0x170   :  { %372 = vsyncpa [#allocation4], 1 }
 0x171   :  { %374 = vsyncpa [#allocation4 + $0x1], 1 }

</bundles_post_ra>
